<compile_context>
chip_gen: v7x
topology: tpu7x:2x2x1
jax: 0.10.0
libtpu: 0.0.40
codegen_flags: <defaults>
</compile_context>

<pallas_src>
import jax
import jax.numpy as jnp
from jax.experimental import pallas as pl
from jax.experimental.pallas import tpu as pltpu

TILE_REPEAT = 416     # copies of gelu^6(x) along the feature axis
NUM_GELU = 6          # chained exact GELUs applied to every element

ROW_TILE = 256        # rows per block (multiple of 8)
MAX_OUT_LANES = 2048  # target output-block width; 256x2048 f32 = 2 MiB/buffer,
                      # double-buffered it fits the 32 MiB scoped VMEM default
                      # on v5e/v6e and is safe for v7x's 64 MiB total VMEM.


def _gelu_exact(x):
    # PyTorch F.gelu default: 0.5 * x * (1 + erf(x / sqrt(2)))
    return 0.5 * x * (1.0 + jax.lax.erf(x * 0.7071067811865476))


def _divisors(n):
    return [d for d in range(1, n + 1) if n % d == 0]


def _choose_repeat_tile(d, out_w, max_lanes):
    """Copies of the width-d result per output block (must divide TILE_REPEAT)."""
    if out_w <= max_lanes:
        return TILE_REPEAT                        # whole output width in one block
    cands = [t for t in _divisors(TILE_REPEAT)
             if t * d <= max_lanes and (t * d) % 128 == 0]
    if cands:
        return max(cands)                         # lane-dense output block
    # No lane-dense divisor (tiny/odd D with a huge 416*D): fall back to the
    # full width, which is always a legal block (equals the array dim).
    return TILE_REPEAT


def _reps_per_store(tr, d):
    """Smallest divisor r of tr with r*d >= 128 lanes (mostly-unmasked stores)."""
    for r in range(1, tr + 1):
        if tr % r == 0 and r * d >= 128:
            return r
    return tr


def _gelu_chain_tile_kernel(x_ref, o_ref, y_ref):
    d = x_ref.shape[-1]
    tr = o_ref.shape[-1] // d          # copies written by this grid step
    r = pl.program_id(1)

    # Compute the 6x GELU chain once per row tile (first repeat step), in f32,
    # and stash it in VMEM scratch; all remaining repeat steps are pure stores.
    @pl.when(r == 0)
    def _():
        y = x_ref[...].astype(jnp.float32)
        for _ in range(NUM_GELU):
            y = _gelu_exact(y)
        y_ref[...] = y.astype(y_ref.dtype)

    y = y_ref[...]
    # Widen the stored unit to >=128 lanes so stores are (mostly) unmasked,
    # without ever materializing the full output block in registers.
    reps = _reps_per_store(tr, d)
    unit = y if reps == 1 else jnp.tile(y, (1, reps))
    w = reps * d
    for c in range(tr // reps):
        o_ref[:, c * w:(c + 1) * w] = unit


def model_forward(x):
    """Equivalent of Model().forward(x) for x of shape (B, S, D)."""
    B, S, D = x.shape
    rows = B * S
    out_w = TILE_REPEAT * D
    x2d = x.reshape(rows, D)

    # ---- row tiling (pad to a multiple of the row tile if needed) ----
    if rows <= ROW_TILE:
        tm = rows                      # single block == full dim (always legal)
        padded_rows = rows
    else:
        tm = ROW_TILE
        padded_rows = pl.cdiv(rows, tm) * tm
        if padded_rows != rows:
            x2d = jnp.pad(x2d, ((0, padded_rows - rows), (0, 0)))

    # ---- repeat-axis tiling (lane-dense output blocks) ----
    tr = _choose_repeat_tile(D, out_w, MAX_OUT_LANES)
    grid = (padded_rows // tm, TILE_REPEAT // tr)

    dtype_size = jnp.dtype(x.dtype).itemsize
    cost = pl.CostEstimate(
        flops=rows * D * NUM_GELU * 10,
        transcendentals=rows * D * NUM_GELU,
        bytes_accessed=(1 + TILE_REPEAT) * rows * D * dtype_size,
    )

    out2d = pl.pallas_call(
        _gelu_chain_tile_kernel,
        out_shape=jax.ShapeDtypeStruct((padded_rows, out_w), x.dtype),
        grid=grid,
        # Input block depends only on the row-tile index -> no re-DMA across
        # the repeat axis.
        in_specs=[pl.BlockSpec((tm, D), lambda i, r: (i, 0))],
        out_specs=pl.BlockSpec((tm, tr * D), lambda i, r: (i, r)),
        scratch_shapes=[pltpu.VMEM((tm, D), x.dtype)],
        compiler_params=pltpu.CompilerParams(
            # Row tiles are independent (shard across v7x's 2 TensorCores);
            # the repeat axis carries the per-row-tile scratch -> sequential.
            dimension_semantics=("parallel", "arbitrary"),
        ),
        cost_estimate=cost,
    )(x2d)

    if padded_rows != rows:
        out2d = out2d[:rows]
    return out2d.reshape(B, S, out_w)


def _reference_forward(x):
    """Pure-JAX reference mirroring the PyTorch graph literally."""
    g = lambda t: jax.nn.gelu(t, approximate=False)
    x2 = jnp.concatenate([g(x), g(x)], axis=-1)
    x3 = jnp.concatenate([g(x2), g(x2)], axis=-1)
    x4 = jnp.concatenate([g(x3), g(x3)], axis=-1)
    x5 = jnp.concatenate([g(x4), g(x4)], axis=-1)
    x6 = jnp.concatenate([g(x5), g(x5)], axis=-1)
    x7 = jnp.concatenate([x6, g(x5)], axis=-1)
    x8 = jnp.concatenate([x7, g(x5)], axis=-1)
    x9 = jnp.concatenate([x8, g(x5)], axis=-1)
    x10 = jnp.concatenate([x9, g(x5)], axis=-1)
    x11 = jnp.concatenate([x10, g(x5)], axis=-1)
    x12 = jnp.concatenate([x11, g(x5)], axis=-1)
    x13 = jnp.concatenate([x12, g(x5)], axis=-1)
    x14 = jnp.concatenate([x13, g(x5)], axis=-1)
    x15 = jnp.concatenate([x14, g(x5)], axis=-1)
    x16 = jnp.concatenate([x15, g(x5)], axis=-1)
    x17 = jnp.concatenate([x16, g(x5)], axis=-1)
    x18 = jnp.concatenate([g(x17), g(x17)], axis=-1)
    return x18


def _collapsed_reference(x):
    """Algebraically collapsed reference: tile(gelu^6(x), 416)."""
    y = x
    for _ in range(NUM_GELU):
        y = jax.nn.gelu(y, approximate=False)
    return jnp.tile(y, (1, 1, TILE_REPEAT))


if __name__ == "__main__":
    # 1) Toy shape from the module spec — check against the literal concat graph.
    x_small = jax.random.normal(jax.random.PRNGKey(0), (1, 2, 2), dtype=jnp.float32)
    out_small = jax.block_until_ready(model_forward(x_small))
    ref_small = _reference_forward(x_small)
    assert out_small.shape == ref_small.shape == (1, 2, 2 * TILE_REPEAT), (
        out_small.shape, ref_small.shape)
    assert jnp.allclose(out_small, ref_small, atol=1e-5, rtol=1e-5), "toy mismatch"

    # 2) Larger shape exercising the (row x repeat) grid with lane-dense D.
    x_big = jax.random.normal(jax.random.PRNGKey(1), (2, 256, 128), dtype=jnp.float32)
    out_big = jax.block_until_ready(model_forward(x_big))
    ref_big = _collapsed_reference(x_big)
    assert out_big.shape == ref_big.shape, (out_big.shape, ref_big.shape)
    assert jnp.allclose(out_big, ref_big, atol=1e-5, rtol=1e-5), "grid mismatch"

    # 3) Ragged row count (exercises the row-padding path) with D=64.
    x_rag = jax.random.normal(jax.random.PRNGKey(2), (3, 100, 64), dtype=jnp.float32)
    out_rag = jax.block_until_ready(model_forward(x_rag))
    ref_rag = _collapsed_reference(x_rag)
    assert out_rag.shape == ref_rag.shape, (out_rag.shape, ref_rag.shape)
    assert jnp.allclose(out_rag, ref_rag, atol=1e-5, rtol=1e-5), "ragged mismatch"

    print("KERNEL_OK")
</pallas_src>

<mosaic_0001>
module attributes {stable_mosaic.version = 11 : i64} {
  func.func @_gelu_chain_tile_kernel(%arg0: i32, %arg1: i32, %arg2: memref<2x2xf32, #tpu.memory_space<vmem>>, %arg3: memref<2x832xf32, #tpu.memory_space<vmem>>, %arg4: memref<2x2xf32, #tpu.memory_space<vmem>>) attributes {dimension_semantics = [#tpu.dimension_semantics<parallel>, #tpu.dimension_semantics<arbitrary>], iteration_bounds = array<i64: 1, 1>, scalar_prefetch = 0 : i64, scratch_operands = 1 : i64, tpu.core_type = #tpu.core_type<tc>, window_params = [{transform_indices = @transform_0, window_bounds = array<i64: 2, 2>}, {transform_indices = @transform_1, window_bounds = array<i64: 2, 832>}]} {
    %c0_i32 = arith.constant 0 : i32
    %0 = arith.cmpi eq, %arg1, %c0_i32 : i32
    %1 = arith.extui %0 : i1 to i32
    %c0_i32_0 = arith.constant 0 : i32
    %2 = arith.cmpi ne, %1, %c0_i32_0 : i32
    scf.if %2 {
      %c0_7 = arith.constant 0 : index
      %c0_8 = arith.constant 0 : index
      %9 = vector.load %arg2[%c0_7, %c0_8] : memref<2x2xf32, #tpu.memory_space<vmem>>, vector<2x2xf32>
      %cst = arith.constant 5.000000e-01 : f32
      %10 = vector.broadcast %cst : f32 to vector<2x2xf32>
      %11 = arith.mulf %10, %9 : vector<2x2xf32>
      %cst_9 = arith.constant 0.707106769 : f32
      %12 = vector.broadcast %cst_9 : f32 to vector<2x2xf32>
      %13 = arith.mulf %9, %12 : vector<2x2xf32>
      %14 = math.erf %13 : vector<2x2xf32>
      %cst_10 = arith.constant 1.000000e+00 : f32
      %15 = vector.broadcast %cst_10 : f32 to vector<2x2xf32>
      %16 = arith.addf %15, %14 : vector<2x2xf32>
      %17 = arith.mulf %11, %16 : vector<2x2xf32>
      %cst_11 = arith.constant 5.000000e-01 : f32
      %18 = vector.broadcast %cst_11 : f32 to vector<2x2xf32>
      %19 = arith.mulf %18, %17 : vector<2x2xf32>
      %cst_12 = arith.constant 0.707106769 : f32
      %20 = vector.broadcast %cst_12 : f32 to vector<2x2xf32>
      %21 = arith.mulf %17, %20 : vector<2x2xf32>
      %22 = math.erf %21 : vector<2x2xf32>
      %cst_13 = arith.constant 1.000000e+00 : f32
      %23 = vector.broadcast %cst_13 : f32 to vector<2x2xf32>
      %24 = arith.addf %23, %22 : vector<2x2xf32>
      %25 = arith.mulf %19, %24 : vector<2x2xf32>
      %cst_14 = arith.constant 5.000000e-01 : f32
      %26 = vector.broadcast %cst_14 : f32 to vector<2x2xf32>
      %27 = arith.mulf %26, %25 : vector<2x2xf32>
      %cst_15 = arith.constant 0.707106769 : f32
      %28 = vector.broadcast %cst_15 : f32 to vector<2x2xf32>
      %29 = arith.mulf %25, %28 : vector<2x2xf32>
      %30 = math.erf %29 : vector<2x2xf32>
      %cst_16 = arith.constant 1.000000e+00 : f32
      %31 = vector.broadcast %cst_16 : f32 to vector<2x2xf32>
      %32 = arith.addf %31, %30 : vector<2x2xf32>
      %33 = arith.mulf %27, %32 : vector<2x2xf32>
      %cst_17 = arith.constant 5.000000e-01 : f32
      %34 = vector.broadcast %cst_17 : f32 to vector<2x2xf32>
      %35 = arith.mulf %34, %33 : vector<2x2xf32>
      %cst_18 = arith.constant 0.707106769 : f32
      %36 = vector.broadcast %cst_18 : f32 to vector<2x2xf32>
      %37 = arith.mulf %33, %36 : vector<2x2xf32>
      %38 = math.erf %37 : vector<2x2xf32>
      %cst_19 = arith.constant 1.000000e+00 : f32
      %39 = vector.broadcast %cst_19 : f32 to vector<2x2xf32>
      %40 = arith.addf %39, %38 : vector<2x2xf32>
      %41 = arith.mulf %35, %40 : vector<2x2xf32>
      %cst_20 = arith.constant 5.000000e-01 : f32
      %42 = vector.broadcast %cst_20 : f32 to vector<2x2xf32>
      %43 = arith.mulf %42, %41 : vector<2x2xf32>
      %cst_21 = arith.constant 0.707106769 : f32
      %44 = vector.broadcast %cst_21 : f32 to vector<2x2xf32>
      %45 = arith.mulf %41, %44 : vector<2x2xf32>
      %46 = math.erf %45 : vector<2x2xf32>
      %cst_22 = arith.constant 1.000000e+00 : f32
      %47 = vector.broadcast %cst_22 : f32 to vector<2x2xf32>
      %48 = arith.addf %47, %46 : vector<2x2xf32>
      %49 = arith.mulf %43, %48 : vector<2x2xf32>
      %cst_23 = arith.constant 5.000000e-01 : f32
      %50 = vector.broadcast %cst_23 : f32 to vector<2x2xf32>
      %51 = arith.mulf %50, %49 : vector<2x2xf32>
      %cst_24 = arith.constant 0.707106769 : f32
      %52 = vector.broadcast %cst_24 : f32 to vector<2x2xf32>
      %53 = arith.mulf %49, %52 : vector<2x2xf32>
      %54 = math.erf %53 : vector<2x2xf32>
      %cst_25 = arith.constant 1.000000e+00 : f32
      %55 = vector.broadcast %cst_25 : f32 to vector<2x2xf32>
      %56 = arith.addf %55, %54 : vector<2x2xf32>
      %57 = arith.mulf %51, %56 : vector<2x2xf32>
      %c0_26 = arith.constant 0 : index
      %c0_27 = arith.constant 0 : index
      %58 = vector.load %arg4[%c0_26, %c0_27] : memref<2x2xf32, #tpu.memory_space<vmem>>, vector<2x2xf32>
      tpu.vector_store %arg4[%c0_26, %c0_27], %57 {strides = array<i32>} : memref<2x2xf32, #tpu.memory_space<vmem>>, vector<2x2xf32>,
    } else {
    }
    %c0 = arith.constant 0 : index
    %c0_1 = arith.constant 0 : index
    %3 = vector.load %arg4[%c0, %c0_1] : memref<2x2xf32, #tpu.memory_space<vmem>>, vector<2x2xf32>
    %4 = tpu.concatenate %3, %3, %3, %3, %3, %3, %3, %3, %3, %3, %3, %3, %3, %3, %3, %3, %3, %3, %3, %3, %3, %3, %3, %3, %3, %3, %3, %3, %3, %3, %3, %3, %3, %3, %3, %3, %3, %3, %3, %3, %3, %3, %3, %3, %3, %3, %3, %3, %3, %3, %3, %3, %3, %3, %3, %3, %3, %3, %3, %3, %3, %3, %3, %3, %3, %3, %3, %3, %3, %3, %3, %3, %3, %3, %3, %3, %3, %3, %3, %3, %3, %3, %3, %3, %3, %3, %3, %3, %3, %3, %3, %3, %3, %3, %3, %3, %3, %3, %3, %3, %3, %3, %3, %3 in 1 : vector<2x2xf32>, vector<2x2xf32>, vector<2x2xf32>, vector<2x2xf32>, vector<2x2xf32>, vector<2x2xf32>, vector<2x2xf32>, vector<2x2xf32>, vector<2x2xf32>, vector<2x2xf32>, vector<2x2xf32>, vector<2x2xf32>, vector<2x2xf32>, vector<2x2xf32>, vector<2x2xf32>, vector<2x2xf32>, vector<2x2xf32>, vector<2x2xf32>, vector<2x2xf32>, vector<2x2xf32>, vector<2x2xf32>, vector<2x2xf32>, vector<2x2xf32>, vector<2x2xf32>, vector<2x2xf32>, vector<2x2xf32>, vector<2x2xf32>, vector<2x2xf32>, vector<2x2xf32>, vector<2x2xf32>, vector<2x2xf32>, vector<2x2xf32>, vector<2x2xf32>, vector<2x2xf32>, vector<2x2xf32>, vector<2x2xf32>, vector<2x2xf32>, vector<2x2xf32>, vector<2x2xf32>, vector<2x2xf32>, vector<2x2xf32>, vector<2x2xf32>, vector<2x2xf32>, vector<2x2xf32>, vector<2x2xf32>, vector<2x2xf32>, vector<2x2xf32>, vector<2x2xf32>, vector<2x2xf32>, vector<2x2xf32>, vector<2x2xf32>, vector<2x2xf32>, vector<2x2xf32>, vector<2x2xf32>, vector<2x2xf32>, vector<2x2xf32>, vector<2x2xf32>, vector<2x2xf32>, vector<2x2xf32>, vector<2x2xf32>, vector<2x2xf32>, vector<2x2xf32>, vector<2x2xf32>, vector<2x2xf32>, vector<2x2xf32>, vector<2x2xf32>, vector<2x2xf32>, vector<2x2xf32>, vector<2x2xf32>, vector<2x2xf32>, vector<2x2xf32>, vector<2x2xf32>, vector<2x2xf32>, vector<2x2xf32>, vector<2x2xf32>, vector<2x2xf32>, vector<2x2xf32>, vector<2x2xf32>, vector<2x2xf32>, vector<2x2xf32>, vector<2x2xf32>, vector<2x2xf32>, vector<2x2xf32>, vector<2x2xf32>, vector<2x2xf32>, vector<2x2xf32>, vector<2x2xf32>, vector<2x2xf32>, vector<2x2xf32>, vector<2x2xf32>, vector<2x2xf32>, vector<2x2xf32>, vector<2x2xf32>, vector<2x2xf32>, vector<2x2xf32>, vector<2x2xf32>, vector<2x2xf32>, vector<2x2xf32>, vector<2x2xf32>, vector<2x2xf32>, vector<2x2xf32>, vector<2x2xf32>, vector<2x2xf32>, vector<2x2xf32> -> vector<2x208xf32>
    %c0_2 = arith.constant 0 : index
    %c0_3 = arith.constant 0 : index
    %5 = vector.load %arg3[%c0_2, %c0_3] : memref<2x832xf32, #tpu.memory_space<vmem>>, vector<2x208xf32>
    tpu.vector_store %arg3[%c0_2, %c0_3], %4 {strides = array<i32>} : memref<2x832xf32, #tpu.memory_space<vmem>>, vector<2x208xf32>,
    %c0_4 = arith.constant 0 : index
    %c208 = arith.constant 208 : index
    %6 = vector.load %arg3[%c0_4, %c208] : memref<2x832xf32, #tpu.memory_space<vmem>>, vector<2x208xf32>
    tpu.vector_store %arg3[%c0_4, %c208], %4 {strides = array<i32>} : memref<2x832xf32, #tpu.memory_space<vmem>>, vector<2x208xf32>,
    %c0_5 = arith.constant 0 : index
    %c416 = arith.constant 416 : index
    %7 = vector.load %arg3[%c0_5, %c416] : memref<2x832xf32, #tpu.memory_space<vmem>>, vector<2x208xf32>
    tpu.vector_store %arg3[%c0_5, %c416], %4 {strides = array<i32>} : memref<2x832xf32, #tpu.memory_space<vmem>>, vector<2x208xf32>,
    %c0_6 = arith.constant 0 : index
    %c624 = arith.constant 624 : index
    %8 = vector.load %arg3[%c0_6, %c624] : memref<2x832xf32, #tpu.memory_space<vmem>>, vector<2x208xf32>
    tpu.vector_store %arg3[%c0_6, %c624], %4 {strides = array<i32>} : memref<2x832xf32, #tpu.memory_space<vmem>>, vector<2x208xf32>,
    return
  }
  func.func @transform_0(%arg0: i32, %arg1: i32) -> (i32, i32) {
    %c0_i32 = arith.constant 0 : i32
    %c0_i32_0 = arith.constant 0 : i32
    return %arg0, %c0_i32 : i32, i32
  }
  func.func @transform_1(%arg0: i32, %arg1: i32) -> (i32, i32) {
    %c0_i32 = arith.constant 0 : i32
    return %arg0, %arg1 : i32, i32
  }
}

</mosaic_0001>

<bundles_post_ra>
// kernel: tpu_custom_call.1
= control target key start
LH: loop header
LB: loop body
LE: loop exit
PB: predicated region body
PF: predicated region fallthrough
CT: control target
= control target key end

     0   :  { %6 = vsyncpa [#allocation4], 0  ;;  %s743_s0 = inlined_call_operand.hbm [shape: f32[2,2], index: 0, kind: input, shape index: {}]   ;;  %s744_s1 = inlined_call_operand.hbm [shape: f32[2,832], index: 1, kind: output, shape index: {}]  }
   0x1   :  { %7 = vsyncpa [#allocation5], 0  ;;  %s561_s6 = smov [#allocation3]   ;;  %s513_s10 = scalar_lea.hbm %s743_s0, 32 }
   0x2   :  { %s14_s7 = sshll.u32 %s561_s6, 4  ;;  %p514_p0 = scmp.ne.s32.totalorder %s743_s0, %s513_s10  ;;  %s15_s7 = int_to_ptr.vmem [resolvable:$true] %s14_s7 }
   0x3   :  { %p517_p1 = scmp.lt.u32.totalorder %s513_s10, %s743_s0 }
   0x5   :  { %p519_p2 = pnand %p517_p1, %p514_p0 }
   0x7   :  { %522 = shalt.err (!%p519_p2)
}
   0x8   :  { %s523_s15 = scalar_lea.vmem %s15_s7, 32  ;;  %p528_p4 = scmp.lt.s32.totalorder %s15_s7, %s15_s7 }
   0x9   :  { %p524_p3 = scmp.ne.s32.totalorder %s15_s7, %s523_s15  ;;  %p529_p5 = scmp.lt.s32.totalorder %s523_s15, %s523_s15 }
   0xb   :  { %p530_p6 = por %p529_p5, %p528_p4 }
   0xd   :  { %p531_p7 = pnand %p530_p6, %p524_p3 }
   0xf   :  { %534 = shalt.err (!%p531_p7)
}
  0x10   :  { %17 = dma.hbm_to_vmem [thread:$0]  %s743_s0, 32, %s15_s7, [#allocation4]  }
  0x11   :  { %557 = dma.done.wait [#allocation4], 32  }
  0x12   :  { %558 = vsyncadd [#allocation4], 4294967264  ;;  %v25_v0 = vld [vmem:[#allocation3] sm:$0x3]  ;;  %vm56_vm0 = vcmask 9216   ;;  %s562_s0 = smov 2  }
  0x13   :  { %v27_v1 = vmul.f32 0.70710677, %v25_v0  ;;  %v26_v2 = vmul.f32 0.5, %v25_v0  ;;  %s563_s18 = smov 6   ;;  %s564_s19 = smov 4   ;;  %vm249_vm1 = vcmask 15360  }
  0x14   :  { %s565_s20 = smov 8   ;;  %s566_s21 = smov 10   ;;  %vm251_vm2 = vcmask 31744   ;;  %vm253_vm3 = vcmask 48128   ;;  %vm255_vm4 = vcmask 64512   ;;  %vm257_vm5 = vcmask 80896  }
  0x15   :  { %501 = verf.f32 %v27_v1  ;;  %s567_s22 = smov 12   ;;  %s568_s23 = smov 14   ;;  %vm259_vm6 = vcmask 97280   ;;  %vm261_vm7 = vcmask 113664   ;;  %vm263_vm8 = vcmask 130048  }
  0x16   :  { %s569_s24 = smov 16   ;;  %s570_s25 = smov 18   ;;  %vm265_vm9 = vcmask 146432   ;;  %vm267_vm10 = vcmask 162816   ;;  %vm269_vm11 = vcmask 179200   ;;  %vm271_vm12 = vcmask 195584  }
  0x17   :  { %s571_s26 = smov 20   ;;  %s572_s27 = smov 22   ;;  %vm273_vm13 = vcmask 211968   ;;  %vm275_vm14 = vcmask 228352   ;;  %vm277_vm15 = vcmask 244736  }
  0x18   :  { %s573_s28 = smov 24   ;;  %s574_s29 = smov 26  }
  0x19   :  { %s575_s30 = smov 28   ;;  %s576_s2 = smov 30  }
  0x1a   :  { %s577_s3 = smov 32   ;;  %s578_s4 = smov 34  }
  0x1b   :  { %s579_s5 = smov 36   ;;  %s580_s6 = smov 38  }
  0x1c   :  { %s581_s7 = smov 40   ;;  %s582_s8 = smov 42  }
  0x1d   :  { %s583_s9 = smov 44   ;;  %s584_s10 = smov 46  }
  0x1e   :  { %s585_s11 = smov 48   ;;  %s586_s12 = smov 50  }
  0x1f   :  { %v502_v3 = vpop.eup %501  ;;  %s587_s13 = smov 52   ;;  %s588_s14 = smov 54  }
  0x20   :  { %v29_v4 = vadd.f32 1.0, %v502_v3  ;;  %s589_s15 = smov 56   ;;  %s590_s16 = smov 58  }
  0x21   :  { %s591_s17 = smov 60  }
  0x22   :  { %v30_v5 = vmul.f32 %v29_v4, %v26_v2 }
  0x24   :  { %v32_v6 = vmul.f32 0.70710677, %v30_v5  ;;  %v31_v7 = vmul.f32 0.5, %v30_v5 }
  0x26   :  { %503 = verf.f32 %v32_v6 }
  0x30   :  { %v504_v8 = vpop.eup %503 }
  0x31   :  { %v34_v9 = vadd.f32 1.0, %v504_v8 }
  0x33   :  { %v35_v10 = vmul.f32 %v34_v9, %v31_v7 }
  0x35   :  { %v37_v11 = vmul.f32 0.70710677, %v35_v10  ;;  %v36_v12 = vmul.f32 0.5, %v35_v10 }
  0x37   :  { %505 = verf.f32 %v37_v11 }
  0x41   :  { %v506_v13 = vpop.eup %505 }
  0x42   :  { %v39_v14 = vadd.f32 1.0, %v506_v13 }
  0x44   :  { %v40_v15 = vmul.f32 %v39_v14, %v36_v12 }
  0x46   :  { %v42_v16 = vmul.f32 0.70710677, %v40_v15  ;;  %v41_v17 = vmul.f32 0.5, %v40_v15 }
  0x48   :  { %507 = verf.f32 %v42_v16 }
  0x52   :  { %v508_v18 = vpop.eup %507 }
  0x53   :  { %v44_v19 = vadd.f32 1.0, %v508_v18 }
  0x55   :  { %v45_v20 = vmul.f32 %v44_v19, %v41_v17 }
  0x57   :  { %v47_v21 = vmul.f32 0.70710677, %v45_v20  ;;  %v46_v22 = vmul.f32 0.5, %v45_v20 }
  0x59   :  { %509 = verf.f32 %v47_v21 }
  0x63   :  { %v510_v23 = vpop.eup %509 }
  0x64   :  { %v49_v24 = vadd.f32 1.0, %v510_v23 }
  0x66   :  { %v50_v25 = vmul.f32 %v49_v24, %v46_v22 }
  0x68   :  { %v52_v26 = vmul.f32 0.70710677, %v50_v25  ;;  %v51_v27 = vmul.f32 0.5, %v50_v25 }
  0x6a   :  { %511 = verf.f32 %v52_v26 }
  0x74   :  { %v512_v28 = vpop.eup %511 }
  0x75   :  { %v54_v29 = vadd.f32 1.0, %v512_v28 }
  0x77   :  { %v55_v30 = vmul.f32 %v54_v29, %v51_v27 }
  0x79   :  { %57 = vst.msk [vmem:[#allocation2] sm:$0x3] %vm56_vm0, %v55_v30  ;;  %vm279_vm0 = vcmask 261120  }
  0x80   :  { %v649_v31 = vld [vmem:[#allocation2] sm:$0x3] }
  0x81   :  { %60 = vrot.lane.b32.xlu0 %v649_v31, %s562_s0  ;;  %66 = vrot.lane.b32.xlu1 %v649_v31, %s563_s18  ;;  %s592_s0 = smov 62   ;;  %s593_s18 = smov 64  }
  0x85   :  { %63 = vrot.lane.b32.xlu0 %v649_v31, %s564_s19  ;;  %69 = vrot.lane.b32.xlu1 %v649_v31, %s565_s20  ;;  %s594_s19 = smov 66   ;;  %s595_s20 = smov 68  }
  0x89   :  { %72 = vrot.lane.b32.xlu0 %v649_v31, %s566_s21  ;;  %75 = vrot.lane.b32.xlu1 %v649_v31, %s567_s22  ;;  %s596_s21 = smov 70   ;;  %s597_s22 = smov 72  }
  0x8d   :  { %78 = vrot.lane.b32.xlu0 %v649_v31, %s568_s23  ;;  %81 = vrot.lane.b32.xlu1 %v649_v31, %s569_s24  ;;  %s598_s23 = smov 74   ;;  %s599_s24 = smov 76  }
  0x91   :  { %84 = vrot.lane.b32.xlu0 %v649_v31, %s570_s25  ;;  %87 = vrot.lane.b32.xlu1 %v649_v31, %s571_s26  ;;  %s600_s25 = smov 78   ;;  %s601_s26 = smov 80  }
  0x95   :  { %90 = vrot.lane.b32.xlu0 %v649_v31, %s572_s27  ;;  %93 = vrot.lane.b32.xlu1 %v649_v31, %s573_s28  ;;  %s602_s27 = smov 82   ;;  %s603_s28 = smov 84  }
  0x99   :  { %96 = vrot.lane.b32.xlu0 %v649_v31, %s574_s29  ;;  %99 = vrot.lane.b32.xlu1 %v649_v31, %s575_s30  ;;  %s604_s29 = smov 86   ;;  %s605_s30 = smov 88  }
  0x9d   :  { %102 = vrot.lane.b32.xlu0 %v649_v31, %s576_s2  ;;  %105 = vrot.lane.b32.xlu1 %v649_v31, %s577_s3  ;;  %s606_s2 = smov 90  }
  0xa1   :  { %108 = vrot.lane.b32.xlu0 %v649_v31, %s578_s4  ;;  %111 = vrot.lane.b32.xlu1 %v649_v31, %s579_s5  ;;  %s607_s4 = smov 92   ;;  %s608_s5 = smov 94  }
  0xa5   :  { %114 = vrot.lane.b32.xlu0 %v649_v31, %s580_s6  ;;  %117 = vrot.lane.b32.xlu1 %v649_v31, %s581_s7  ;;  %s609_s6 = smov 96   ;;  %s610_s7 = smov 98  }
  0xa9   :  { %120 = vrot.lane.b32.xlu0 %v649_v31, %s582_s8  ;;  %123 = vrot.lane.b32.xlu1 %v649_v31, %s583_s9  ;;  %s611_s8 = smov 100   ;;  %s612_s9 = smov 102  }
  0xad   :  { %126 = vrot.lane.b32.xlu0 %v649_v31, %s584_s10  ;;  %129 = vrot.lane.b32.xlu1 %v649_v31, %s585_s11  ;;  %s613_s10 = smov 104   ;;  %s614_s11 = smov 106  }
  0xb1   :  { %132 = vrot.lane.b32.xlu0 %v649_v31, %s586_s12  ;;  %135 = vrot.lane.b32.xlu1 %v649_v31, %s587_s13  ;;  %s615_s12 = smov 108   ;;  %s616_s13 = smov 110  }
  0xb5   :  { %138 = vrot.lane.b32.xlu0 %v649_v31, %s588_s14  ;;  %141 = vrot.lane.b32.xlu1 %v649_v31, %s589_s15  ;;  %s617_s14 = smov 112   ;;  %s618_s15 = smov 114  }
  0xb9   :  { %144 = vrot.lane.b32.xlu0 %v649_v31, %s590_s16  ;;  %147 = vrot.lane.b32.xlu1 %v649_v31, %s591_s17  ;;  %s619_s16 = smov 116   ;;  %s620_s17 = smov 118  }
  0xbd   :  { %150 = vrot.lane.b32.xlu0 %v649_v31, %s592_s0  ;;  %153 = vrot.lane.b32.xlu1 %v649_v31, %s593_s18  ;;  %s621_s0 = smov 120   ;;  %s622_s18 = smov 122  }
  0xc1   :  { %156 = vrot.lane.b32.xlu0 %v649_v31, %s594_s19  ;;  %159 = vrot.lane.b32.xlu1 %v649_v31, %s595_s20  ;;  %s623_s19 = smov 124   ;;  %s624_s20 = smov 126  }
  0xc5   :  { %162 = vrot.lane.b32.xlu0 %v649_v31, %s596_s21  ;;  %165 = vrot.lane.b32.xlu1 %v649_v31, %s597_s22 }
  0xc9   :  { %168 = vrot.lane.b32.xlu0 %v649_v31, %s598_s23  ;;  %171 = vrot.lane.b32.xlu1 %v649_v31, %s599_s24 }
  0xcd   :  { %174 = vrot.lane.b32.xlu0 %v649_v31, %s600_s25  ;;  %177 = vrot.lane.b32.xlu1 %v649_v31, %s601_s26 }
  0xd1   :  { %180 = vrot.lane.b32.xlu0 %v649_v31, %s602_s27  ;;  %183 = vrot.lane.b32.xlu1 %v649_v31, %s603_s28 }
  0xd5   :  { %186 = vrot.lane.b32.xlu0 %v649_v31, %s604_s29  ;;  %189 = vrot.lane.b32.xlu1 %v649_v31, %s605_s30 }
  0xd9   :  { %192 = vrot.lane.b32.xlu0 %v649_v31, %s606_s2  ;;  %195 = vrot.lane.b32.xlu1 %v649_v31, %s607_s4 }
  0xdd   :  { %198 = vrot.lane.b32.xlu0 %v649_v31, %s608_s5  ;;  %201 = vrot.lane.b32.xlu1 %v649_v31, %s609_s6 }
  0xe1   :  { %204 = vrot.lane.b32.xlu0 %v649_v31, %s610_s7  ;;  %207 = vrot.lane.b32.xlu1 %v649_v31, %s611_s8 }
  0xe5   :  { %210 = vrot.lane.b32.xlu0 %v649_v31, %s612_s9  ;;  %213 = vrot.lane.b32.xlu1 %v649_v31, %s613_s10 }
  0xe9   :  { %216 = vrot.lane.b32.xlu0 %v649_v31, %s614_s11  ;;  %219 = vrot.lane.b32.xlu1 %v649_v31, %s615_s12 }
  0xed   :  { %222 = vrot.lane.b32.xlu0 %v649_v31, %s616_s13  ;;  %225 = vrot.lane.b32.xlu1 %v649_v31, %s617_s14 }
  0xf1   :  { %228 = vrot.lane.b32.xlu0 %v649_v31, %s618_s15  ;;  %231 = vrot.lane.b32.xlu1 %v649_v31, %s619_s16 }
  0xf3   :  { %v61_v32 = vpop.permute.xlu0 %60  ;;  %v67_v33 = vpop.permute.xlu1 %66 }
  0xf4   :  { %v250_v34 = vsel %vm249_vm1, %v649_v31, %v61_v32  ;;  %vm281_vm1 = vcmask 277504  }
  0xf5   :  { %234 = vrot.lane.b32.xlu0 %v649_v31, %s620_s17  ;;  %237 = vrot.lane.b32.xlu1 %v649_v31, %s621_s0 }
  0xf7   :  { %v64_v35 = vpop.permute.xlu0 %63  ;;  %v70_v36 = vpop.permute.xlu1 %69 }
  0xf8   :  { %v252_v37 = vsel %vm251_vm2, %v250_v34, %v64_v35  ;;  %vm283_vm2 = vcmask 293888  }
  0xf9   :  { %v254_v38 = vsel %vm253_vm3, %v252_v37, %v67_v33  ;;  %240 = vrot.lane.b32.xlu0 %v649_v31, %s622_s18  ;;  %243 = vrot.lane.b32.xlu1 %v649_v31, %s623_s19  ;;  %vm285_vm3 = vcmask 310272  }
  0xfa   :  { %v256_v39 = vsel %vm255_vm4, %v254_v38, %v70_v36  ;;  %vm287_vm4 = vcmask 326656  }
  0xfb   :  { %v73_v40 = vpop.permute.xlu0 %72  ;;  %v76_v41 = vpop.permute.xlu1 %75 }
  0xfc   :  { %v258_v42 = vsel %vm257_vm5, %v256_v39, %v73_v40  ;;  %vm289_vm5 = vcmask 343040  }
  0xfd   :  { %246 = vrot.lane.b32.xlu0 %v649_v31, %s624_s20  ;;  %v260_v43 = vsel %vm259_vm6, %v258_v42, %v76_v41  ;;  %vm291_vm6 = vcmask 359424  }
  0xff   :  { %v79_v44 = vpop.permute.xlu0 %78  ;;  %v82_v45 = vpop.permute.xlu1 %81 }
 0x100   :  { %v262_v46 = vsel %vm261_vm7, %v260_v43, %v79_v44  ;;  %vm293_vm7 = vcmask 375808  }
 0x101   :  { %v264_v47 = vsel %vm263_vm8, %v262_v46, %v82_v45  ;;  %vm295_vm8 = vcmask 392192  }
 0x103   :  { %v85_v48 = vpop.permute.xlu0 %84  ;;  %v88_v49 = vpop.permute.xlu1 %87 }
 0x104   :  { %v266_v50 = vsel %vm265_vm9, %v264_v47, %v85_v48  ;;  %vm297_vm9 = vcmask 408576  }
 0x105   :  { %v268_v51 = vsel %vm267_vm10, %v266_v50, %v88_v49  ;;  %vm299_vm10 = vcmask 424960  }
 0x107   :  { %v91_v52 = vpop.permute.xlu0 %90  ;;  %v94_v53 = vpop.permute.xlu1 %93 }
 0x108   :  { %v270_v54 = vsel %vm269_vm11, %v268_v51, %v91_v52  ;;  %vm301_vm11 = vcmask 441344  }
 0x109   :  { %v272_v55 = vsel %vm271_vm12, %v270_v54, %v94_v53  ;;  %vm303_vm12 = vcmask 457728  }
 0x10b   :  { %v97_v56 = vpop.permute.xlu0 %96  ;;  %v100_v57 = vpop.permute.xlu1 %99 }
 0x10c   :  { %v274_v58 = vsel %vm273_vm13, %v272_v55, %v97_v56  ;;  %vm305_vm13 = vcmask 474112  }
 0x10d   :  { %v276_v59 = vsel %vm275_vm14, %v274_v58, %v100_v57  ;;  %vm307_vm14 = vcmask 490496  }
 0x10f   :  { %v103_v60 = vpop.permute.xlu0 %102  ;;  %v106_v61 = vpop.permute.xlu1 %105 }
 0x110   :  { %v278_v62 = vsel %vm277_vm15, %v276_v59, %v103_v60  ;;  %vm309_vm15 = vcmask 506880  }
 0x111   :  { %v280_v63 = vsel %vm279_vm0, %v278_v62, %v106_v61 }
 0x113   :  { %v109_v0 = vpop.permute.xlu0 %108  ;;  %v112_v1 = vpop.permute.xlu1 %111 }
 0x114   :  { %v282_v2 = vsel %vm281_vm1, %v280_v63, %v109_v0  ;;  %vm311_vm1 = vcmask 523264  }
 0x115   :  { %v284_v3 = vsel %vm283_vm2, %v282_v2, %v112_v1  ;;  %vm313_vm2 = vcmask 539648  }
 0x117   :  { %v115_v4 = vpop.permute.xlu0 %114  ;;  %v118_v5 = vpop.permute.xlu1 %117 }
 0x118   :  { %v286_v6 = vsel %vm285_vm3, %v284_v3, %v115_v4  ;;  %vm315_vm3 = vcmask 556032  }
 0x119   :  { %v288_v7 = vsel %vm287_vm4, %v286_v6, %v118_v5  ;;  %vm317_vm4 = vcmask 572416  }
 0x11b   :  { %v121_v8 = vpop.permute.xlu0 %120  ;;  %v124_v9 = vpop.permute.xlu1 %123 }
 0x11c   :  { %v290_v10 = vsel %vm289_vm5, %v288_v7, %v121_v8  ;;  %vm319_vm5 = vcmask 588800  }
 0x11d   :  { %v292_v11 = vsel %vm291_vm6, %v290_v10, %v124_v9  ;;  %vm321_vm6 = vcmask 605184  }
 0x11f   :  { %v127_v12 = vpop.permute.xlu0 %126  ;;  %v130_v13 = vpop.permute.xlu1 %129 }
 0x120   :  { %v294_v14 = vsel %vm293_vm7, %v292_v11, %v127_v12  ;;  %vm323_vm7 = vcmask 621568  }
 0x121   :  { %v296_v15 = vsel %vm295_vm8, %v294_v14, %v130_v13  ;;  %vm325_vm8 = vcmask 637952  }
 0x123   :  { %v133_v16 = vpop.permute.xlu0 %132  ;;  %v136_v17 = vpop.permute.xlu1 %135 }
 0x124   :  { %v298_v18 = vsel %vm297_vm9, %v296_v15, %v133_v16  ;;  %vm327_vm9 = vcmask 654336  }
 0x125   :  { %v300_v19 = vsel %vm299_vm10, %v298_v18, %v136_v17  ;;  %vm329_vm10 = vcmask 670720  }
 0x127   :  { %v139_v20 = vpop.permute.xlu0 %138  ;;  %v142_v21 = vpop.permute.xlu1 %141 }
 0x128   :  { %v302_v22 = vsel %vm301_vm11, %v300_v19, %v139_v20  ;;  %vm331_vm11 = vcmask 687104  }
 0x129   :  { %v304_v23 = vsel %vm303_vm12, %v302_v22, %v142_v21  ;;  %vm333_vm12 = vcmask 703488   ;;  %v625_v22 = vmov 1983009808  }
 0x12b   :  { %v145_v24 = vpop.permute.xlu0 %144  ;;  %v148_v25 = vpop.permute.xlu1 %147 }
 0x12c   :  { %v306_v26 = vsel %vm305_vm13, %v304_v23, %v145_v24  ;;  %vm335_vm13 = vcmask 719872   ;;  %v379_v23 = vunpack.c.l.s4 %v625_v22  ;;  %v381_v24 = vlaneseq }
 0x12d   :  { %v308_v27 = vsel %vm307_vm14, %v306_v26, %v148_v25  ;;  %vm337_vm14 = vcmask 736256  }
 0x12f   :  { %v151_v28 = vpop.permute.xlu0 %150  ;;  %v154_v29 = vpop.permute.xlu1 %153 }
 0x130   :  { %v310_v30 = vsel %vm309_vm15, %v308_v27, %v151_v28  ;;  %vm339_vm15 = vcmask 752640   ;;  %v380_v28 = vunpack.c.0.s8 %v379_v23 }
 0x131   :  { %v312_v31 = vsel %vm311_vm1, %v310_v30, %v154_v29  ;;  %vm341_vm1 = vcmask 769024   ;;  %v382_v29 = vshrl.u32 %v381_v24, 7 }
 0x133   :  { %v157_v32 = vpop.permute.xlu0 %156  ;;  %v160_v33 = vpop.permute.xlu1 %159 }
 0x134   :  { %v314_v34 = vsel %vm313_vm2, %v312_v31, %v157_v32  ;;  %vm343_vm2 = vcmask 785408  }
 0x135   :  { %v316_v35 = vsel %vm315_vm3, %v314_v34, %v160_v33  ;;  %vm345_vm3 = vcmask 801792   ;;  %v383_v33 = vsub.s32 %v380_v28, %v382_v29 }
 0x137   :  { %v163_v36 = vpop.permute.xlu0 %162  ;;  %v166_v37 = vpop.permute.xlu1 %165 }
 0x138   :  { %v318_v38 = vsel %vm317_vm4, %v316_v35, %v163_v36  ;;  %vm347_vm4 = vcmask 818176  }
 0x139   :  { %v320_v39 = vsel %vm319_vm5, %v318_v38, %v166_v37  ;;  %vm349_vm5 = vcmask 834560  }
 0x13b   :  { %v169_v40 = vpop.permute.xlu0 %168  ;;  %v172_v41 = vpop.permute.xlu1 %171 }
 0x13c   :  { %v322_v42 = vsel %vm321_vm6, %v320_v39, %v169_v40  ;;  %vm351_vm6 = vcmask 850944  }
 0x13d   :  { %v324_v43 = vsel %vm323_vm7, %v322_v42, %v172_v41  ;;  %vm353_vm7 = vcmask 867328  }
 0x13f   :  { %v175_v44 = vpop.permute.xlu0 %174  ;;  %v178_v45 = vpop.permute.xlu1 %177 }
 0x140   :  { %v719_v46 = vsel %vm325_vm8, %v324_v43, %v175_v44  ;;  %vm355_vm8 = vcmask 883712  }
 0x141   :  { %v328_v47 = vsel %vm327_vm9, %v719_v46, %v178_v45 }
 0x143   :  { %v181_v48 = vpop.permute.xlu0 %180  ;;  %v184_v49 = vpop.permute.xlu1 %183 }
 0x144   :  { %v330_v50 = vsel %vm329_vm10, %v328_v47, %v181_v48  ;;  %vm357_vm10 = vcmask 900096  }
 0x145   :  { %v332_v51 = vsel %vm331_vm11, %v330_v50, %v184_v49  ;;  %vm359_vm11 = vcmask 916480  }
 0x147   :  { %v187_v52 = vpop.permute.xlu0 %186  ;;  %v190_v53 = vpop.permute.xlu1 %189 }
 0x148   :  { %v334_v54 = vsel %vm333_vm12, %v332_v51, %v187_v52  ;;  %vm361_vm12 = vcmask 932864  }
 0x149   :  { %v336_v55 = vsel %vm335_vm13, %v334_v54, %v190_v53  ;;  %vm363_vm13 = vcmask 949248  }
 0x14b   :  { %v193_v56 = vpop.permute.xlu0 %192  ;;  %v196_v57 = vpop.permute.xlu1 %195 }
 0x14c   :  { %v338_v58 = vsel %vm337_vm14, %v336_v55, %v193_v56  ;;  %vm365_vm14 = vcmask 965632  }
 0x14d   :  { %v340_v59 = vsel %vm339_vm15, %v338_v58, %v196_v57  ;;  %vm367_vm15 = vcmask 982016  }
 0x14f   :  { %v199_v60 = vpop.permute.xlu0 %198  ;;  %v202_v61 = vpop.permute.xlu1 %201 }
 0x150   :  { %v342_v62 = vsel %vm341_vm1, %v340_v59, %v199_v60  ;;  %vm369_vm1 = vcmask 998400  }
 0x151   :  { %v344_v63 = vsel %vm343_vm2, %v342_v62, %v202_v61  ;;  %vm371_vm2 = vcmask 1014784  }
 0x153   :  { %v205_v0 = vpop.permute.xlu0 %204  ;;  %v208_v1 = vpop.permute.xlu1 %207 }
 0x154   :  { %v346_v2 = vsel %vm345_vm3, %v344_v63, %v205_v0  ;;  %vm373_vm3 = vcmask 1031168  }
 0x155   :  { %v348_v3 = vsel %vm347_vm4, %v346_v2, %v208_v1  ;;  %vm386_vm4 = vcmask 1041408  }
 0x157   :  { %v211_v4 = vpop.permute.xlu0 %210  ;;  %v214_v5 = vpop.permute.xlu1 %213 }
 0x158   :  { %v350_v6 = vsel %vm349_vm5, %v348_v3, %v211_v4  ;;  %vm387_vm5 = vcmask 650242  }
 0x159   :  { %v352_v7 = vsel %vm351_vm6, %v350_v6, %v214_v5  ;;  %vm388_vm6 = vmor %vm387_vm5, %vm386_vm4  ;;  %vm417_vm4 = vcmask 521220  }
 0x15b   :  { %v217_v8 = vpop.permute.xlu0 %216  ;;  %v220_v9 = vpop.permute.xlu1 %219 }
 0x15c   :  { %v354_v10 = vsel %vm353_vm7, %v352_v7, %v217_v8  ;;  %vm395_vm7 = vcmask 1042048  }
 0x15d   :  { %v356_v11 = vsel %vm355_vm8, %v354_v10, %v220_v9  ;;  %vm396_vm8 = vcmask 1043458  }
 0x15f   :  { %v223_v12 = vpop.permute.xlu0 %222  ;;  %v226_v13 = vpop.permute.xlu1 %225 }
 0x160   :  { %v358_v14 = vsel %vm357_vm10, %v356_v11, %v223_v12  ;;  %vm397_vm10 = vmor %vm396_vm8, %vm395_vm7 }
 0x161   :  { %v360_v15 = vsel %vm359_vm11, %v358_v14, %v226_v13 }
 0x163   :  { %v229_v16 = vpop.permute.xlu0 %228  ;;  %v232_v17 = vpop.permute.xlu1 %231 }
 0x164   :  { %v362_v18 = vsel %vm361_vm12, %v360_v15, %v229_v16  ;;  %vm398_vm12 = vcmask 259076  }
 0x165   :  { %v364_v19 = vsel %vm363_vm13, %v362_v18, %v232_v17  ;;  %vm406_vm13 = vcmask 1041664  }
 0x167   :  { %v235_v20 = vpop.permute.xlu0 %234  ;;  %v238_v21 = vpop.permute.xlu1 %237 }
 0x168   :  { %v366_v25 = vsel %vm365_vm14, %v364_v19, %v235_v20  ;;  %vm407_vm14 = vcmask 912386  }
 0x169   :  { %v368_v26 = vsel %vm367_vm15, %v366_v25, %v238_v21  ;;  %vm415_vm15 = vcmask 1042304  }
 0x16b   :  { %v241_v27 = vpop.permute.xlu0 %240  ;;  %v244_v31 = vpop.permute.xlu1 %243 }
 0x16c   :  { %v370_v30 = vsel %vm369_vm1, %v368_v26, %v241_v27  ;;  %vm399_vm1 = vmor %vm398_vm12, %vm397_vm10 }
 0x16d   :  { %v372_v32 = vsel %vm371_vm2, %v370_v30, %v244_v31  ;;  %vm408_vm2 = vmor %vm407_vm14, %vm406_vm13 }
 0x16f   :  { %v247_v34 = vpop.permute.xlu0 %246 }
 0x170   :  { %v374_v35 = vsel %vm373_vm3, %v372_v32, %v247_v34  ;;  %vm416_vm3 = vmor %vm396_vm8, %vm415_vm15 }
 0x171   :  { %v377_v36 = vcombine.low %v374_v35, %v719_v46  ;;  %vm418_vm5 = vmor %vm417_vm4, %vm416_vm3 }
 0x173   :  { %v384_v37 = vrot.slane %v377_v36, %v383_v33 }
 0x175   :  { %401 = vrot.lane.b32.xlu0 %v384_v37, %s577_s3  ;;  %390 = vrot.lane.b32.xlu1 %v384_v37, %s601_s26  ;;  %389 = vst.msk [vmem:[#allocation6] sm:$0xf] %vm388_vm6, %v384_v37  ;;  %s626_s3 = smov [#allocation6]  }
 0x176   :  { %s426_s21 = sshll.u32 %s626_s3, 4  ;;  %s427_s21 = int_to_ptr.vmem [resolvable:$true] %s426_s21 }
 0x177   :  { %s535_s22 = scalar_lea.vmem %s427_s21, 224  ;;  %p540_p9 = scmp.lt.s32.totalorder %s427_s21, %s427_s21 }
 0x178   :  { %p536_p8 = scmp.ne.s32.totalorder %s427_s21, %s535_s22  ;;  %p541_p10 = scmp.lt.s32.totalorder %s535_s22, %s535_s22 }
 0x179   :  { %410 = vrot.lane.b32.xlu1 %v384_v37, %s617_s14 }
 0x17a   :  { %p542_p11 = por %p541_p10, %p540_p9 }
 0x17c   :  { %p543_p12 = pnand %p542_p11, %p536_p8 }
 0x1e7   :  { %v402_v38 = vpop.permute.xlu0 %401  ;;  %v391_v39 = vpop.permute.xlu1 %390 }
 0x1e8   :  { %v403_v40 = vrot.slane %v402_v38, 6  ;;  %v392_v41 = vrot.slane %v391_v39, 6 }
 0x1ea   :  { %v404_v42 = vsel %vm279_vm0, %v403_v40, %v402_v38  ;;  %v393_v43 = vsel %vm327_vm9, %v392_v41, %v391_v39 }
 0x1eb   :  { %400 = vst.msk [vmem:[#allocation6 + $0x2] sm:$0x3f] %vm399_vm1, %v393_v43  ;;  %v411_v44 = vpop.permute.xlu1 %410 }
 0x1ec   :  { %409 = vst.msk [vmem:[#allocation6 + $0x6] sm:$0xf] %vm408_vm2, %v404_v42  ;;  %v412_v45 = vrot.slane %v411_v44, 6 }
 0x1ee   :  { %v413_v46 = vsel %vm359_vm11, %v412_v45, %v411_v44 }
 0x1ef   :  { %419 = vst.msk [vmem:[#allocation6 + $0x8] sm:$0x3f] %vm418_vm5, %v413_v46 }
 0x1f0   :  { %546 = shalt.err (!%p543_p12)
}
 0x1f1   :  { %s547_s25 = scalar_lea.hbm %s744_s1, 224 }
 0x1f2   :  { %p548_p13 = scmp.ne.s32.totalorder %s744_s1, %s547_s25  ;;  %p551_p0 = scmp.lt.u32.totalorder %s547_s25, %s744_s1 }
 0x1f4   :  { %p553_p1 = pnand %p551_p0, %p548_p13 }
 0x1f6   :  { %556 = shalt.err (!%p553_p1)
}
 0x1f7   :  { %429 = dma.vmem_to_hbm [thread:$0]  %s427_s21, 224, %s744_s1, [#allocation5]  }
 0x1f8   :  { %559 = dma.done.wait [#allocation5], 224  }
 0x1f9   :  { %560 = vsyncadd [#allocation5], 4294967072 }
 0x1fa   :  { %433 = vsyncpa [#allocation4], 1 }
 0x1fb   :  { %434 = vsyncpa [#allocation5], 1 }

</bundles_post_ra>
